<compile_context>
chip_gen: v7x
topology: tpu7x:2x2x1
jax: 0.10.0
libtpu: 0.0.40
codegen_flags: <defaults>
</compile_context>

<pallas_src>
import jax
import jax.numpy as jnp
from jax.experimental import pallas as pl
from jax.experimental.pallas import tpu as pltpu


def _se_layer_kernel(x_ref, w1_ref, w2_ref, out_ref):
    # x_ref / out_ref : (1, C, H*W) f32
    # w1_ref          : (C, C_red)  == fc1.weight.T
    # w2_ref          : (C, C_red)  == fc2.weight (native layout)
    x = x_ref[0]                                              # (C, HW)

    # ---- squeeze: global average pool per channel (lane reduction) ----
    pooled = jnp.mean(x, axis=1, keepdims=True)               # (C, 1)

    # ---- FC1 (C -> C_red), no bias: broadcast-mult + sublane reduce ----
    h = jnp.sum(pooled * w1_ref[...], axis=0, keepdims=True)  # (1, C_red)
    h = jnp.maximum(h, 0.0)                                   # ReLU

    # ---- FC2 (C_red -> C), no bias: broadcast-mult + lane reduce ----
    s = jax.nn.sigmoid(
        jnp.sum(w2_ref[...] * h, axis=1, keepdims=True))      # (C, 1)

    # ---- excite: per-channel scale (lane-broadcast multiply) ----
    out_ref[0] = x * s                                        # (C, HW)


def se_layer_pallas(x_nchw, w1_t, w2):
    """SELayer forward.

    x_nchw : (B, C, H, W) float32
    w1_t   : (C, C_red)   == fc1.weight.T  (fc1: Linear(C, C_red, bias=False))
    w2     : (C, C_red)   == fc2.weight    (fc2: Linear(C_red, C, bias=False))
    returns (B, C, H, W) float32
    """
    B, C, H, W = x_nchw.shape
    C_red = w1_t.shape[1]
    hw = H * W

    x_flat = x_nchw.reshape(B, C, hw)   # lane-dense view (free layout plumbing)

    # Size VMEM from the real block: double-buffered input + output blocks,
    # weights (single-buffered is fine, but count x2 for safety), + headroom.
    blk_bytes = C * hw * 4
    w_bytes = 2 * C * C_red * 4
    vmem_limit = min(128 << 20, 4 * blk_bytes + 2 * w_bytes + (4 << 20))

    out_flat = pl.pallas_call(
        _se_layer_kernel,
        out_shape=jax.ShapeDtypeStruct((B, C, hw), jnp.float32),
        grid_spec=pltpu.PrefetchScalarGridSpec(
            num_scalar_prefetch=0,
            grid=(B,),
            in_specs=[
                pl.BlockSpec((1, C, hw), lambda b: (b, 0, 0)),
                pl.BlockSpec((C, C_red), lambda b: (0, 0)),
                pl.BlockSpec((C, C_red), lambda b: (0, 0)),
            ],
            out_specs=pl.BlockSpec((1, C, hw), lambda b: (b, 0, 0)),
        ),
        compiler_params=pltpu.CompilerParams(
            dimension_semantics=("parallel",),   # shard batch over TCs (v7x)
            vmem_limit_bytes=int(vmem_limit),
        ),
    )(x_flat, w1_t, w2)

    return out_flat.reshape(B, C, H, W)


def se_layer_reference(x_nchw, w1_t, w2):
    """Pure-JAX reference mirroring the PyTorch SELayer."""
    y = jnp.mean(x_nchw, axis=(2, 3))                # (B, C)
    h = jnp.maximum(y @ w1_t, 0.0)                   # (B, C_red)
    s = jax.nn.sigmoid(h @ w2.T)                     # (B, C)
    return x_nchw * s[:, :, None, None]


if __name__ == "__main__":
    # Small shapes consistent with the module: reduction=16 -> need C >= 16.
    B, C, H, W = 2, 32, 16, 16
    reduction = 16
    C_red = C // reduction                            # = 2

    key = jax.random.PRNGKey(0)
    kx, k1, k2 = jax.random.split(key, 3)
    x = jax.random.normal(kx, (B, C, H, W), jnp.float32)
    # SE weights in the layouts the kernel consumes directly:
    #   w1_t == fc1.weight.T (C, C_red), w2 == fc2.weight (C, C_red)
    w1_t = 0.1 * jax.random.normal(k1, (C, C_red), jnp.float32)
    w2 = 0.1 * jax.random.normal(k2, (C, C_red), jnp.float32)

    out = jax.block_until_ready(se_layer_pallas(x, w1_t, w2))

    ref = jax.block_until_ready(se_layer_reference(x, w1_t, w2))
    assert out.shape == (B, C, H, W)
    err = float(jnp.max(jnp.abs(out - ref)))
    if err > 1e-4:
        raise AssertionError(f"Pallas kernel mismatch vs reference: max abs err {err}")

    print("KERNEL_OK")
</pallas_src>

<mosaic_0001>
module attributes {stable_mosaic.version = 11 : i64} {
  func.func @_se_layer_kernel(%arg0: i32, %arg1: memref<1x32x256xf32, #tpu.memory_space<vmem>>, %arg2: memref<32x2xf32, #tpu.memory_space<vmem>>, %arg3: memref<32x2xf32, #tpu.memory_space<vmem>>, %arg4: memref<1x32x256xf32, #tpu.memory_space<vmem>>) attributes {dimension_semantics = [#tpu.dimension_semantics<parallel>], iteration_bounds = array<i64: 2>, scalar_prefetch = 0 : i64, scratch_operands = 0 : i64, tpu.core_type = #tpu.core_type<tc>, window_params = [{transform_indices = @transform_0, window_bounds = array<i64: 1, 32, 256>}, {pipeline_mode = #tpu.pipeline_mode<synchronous>, transform_indices = @transform_1, window_bounds = array<i64: 32, 2>}, {pipeline_mode = #tpu.pipeline_mode<synchronous>, transform_indices = @transform_2, window_bounds = array<i64: 32, 2>}, {transform_indices = @transform_3, window_bounds = array<i64: 1, 32, 256>}]} {
    %c0 = arith.constant 0 : index
    %c0_0 = arith.constant 0 : index
    %c0_1 = arith.constant 0 : index
    %0 = vector.load %arg1[%c0, %c0_0, %c0_1] : memref<1x32x256xf32, #tpu.memory_space<vmem>>, vector<1x32x256xf32>
    %1 = vector.shape_cast %0 : vector<1x32x256xf32> to vector<32x256xf32>
    %cst = arith.constant dense<0.000000e+00> : vector<32xf32>
    %2 = vector.multi_reduction <add>, %1, %cst [1] : vector<32x256xf32> to vector<32xf32>
    %3 = vector.shape_cast %2 : vector<32xf32> to vector<32x1xf32>
    %cst_2 = arith.constant 2.560000e+02 : f32
    %4 = vector.broadcast %cst_2 : f32 to vector<32x1xf32>
    %5 = arith.divf %3, %4 : vector<32x1xf32>
    %c0_3 = arith.constant 0 : index
    %c0_4 = arith.constant 0 : index
    %6 = vector.load %arg2[%c0_3, %c0_4] : memref<32x2xf32, #tpu.memory_space<vmem>>, vector<32x2xf32>
    %7 = vector.broadcast %5 : vector<32x1xf32> to vector<32x2xf32>
    %8 = arith.mulf %7, %6 : vector<32x2xf32>
    %cst_5 = arith.constant dense<0.000000e+00> : vector<2xf32>
    %9 = vector.multi_reduction <add>, %8, %cst_5 [0] : vector<32x2xf32> to vector<2xf32>
    %10 = vector.shape_cast %9 : vector<2xf32> to vector<1x2xf32>
    %cst_6 = arith.constant 0.000000e+00 : f32
    %11 = vector.broadcast %cst_6 : f32 to vector<1x2xf32>
    %12 = arith.maximumf %10, %11 : vector<1x2xf32>
    %c0_7 = arith.constant 0 : index
    %c0_8 = arith.constant 0 : index
    %13 = vector.load %arg3[%c0_7, %c0_8] : memref<32x2xf32, #tpu.memory_space<vmem>>, vector<32x2xf32>
    %14 = vector.broadcast %12 : vector<1x2xf32> to vector<32x2xf32>
    %15 = arith.mulf %13, %14 : vector<32x2xf32>
    %cst_9 = arith.constant dense<0.000000e+00> : vector<32xf32>
    %16 = vector.multi_reduction <add>, %15, %cst_9 [1] : vector<32x2xf32> to vector<32xf32>
    %17 = vector.shape_cast %16 : vector<32xf32> to vector<32x1xf32>
    %18 = arith.negf %17 : vector<32x1xf32>
    %19 = math.exp %18 : vector<32x1xf32>
    %cst_10 = arith.constant 1.000000e+00 : f32
    %20 = vector.broadcast %cst_10 : f32 to vector<32x1xf32>
    %21 = arith.addf %20, %19 : vector<32x1xf32>
    %22 = arith.divf %20, %21 : vector<32x1xf32>
    %23 = vector.broadcast %22 : vector<32x1xf32> to vector<32x256xf32>
    %24 = arith.mulf %1, %23 : vector<32x256xf32>
    %c0_11 = arith.constant 0 : index
    %c0_12 = arith.constant 0 : index
    %c0_13 = arith.constant 0 : index
    %25 = vector.load %arg4[%c0_11, %c0_12, %c0_13] : memref<1x32x256xf32, #tpu.memory_space<vmem>>, vector<1x32x256xf32>
    %26 = vector.shape_cast %25 : vector<1x32x256xf32> to vector<32x256xf32>
    %27 = vector.shape_cast %24 : vector<32x256xf32> to vector<1x32x256xf32>
    tpu.vector_store %arg4[%c0_11, %c0_12, %c0_13], %27 {strides = array<i32>} : memref<1x32x256xf32, #tpu.memory_space<vmem>>, vector<1x32x256xf32>,
    return
  }
  func.func @transform_0(%arg0: i32) -> (i32, i32, i32) {
    %c0_i32 = arith.constant 0 : i32
    %c0_i32_0 = arith.constant 0 : i32
    %c0_i32_1 = arith.constant 0 : i32
    return %arg0, %c0_i32, %c0_i32_0 : i32, i32, i32
  }
  func.func @transform_1(%arg0: i32) -> (i32, i32) {
    %c0_i32 = arith.constant 0 : i32
    %c0_i32_0 = arith.constant 0 : i32
    %c0_i32_1 = arith.constant 0 : i32
    return %c0_i32, %c0_i32_0 : i32, i32
  }
  func.func @transform_2(%arg0: i32) -> (i32, i32) {
    %c0_i32 = arith.constant 0 : i32
    %c0_i32_0 = arith.constant 0 : i32
    %c0_i32_1 = arith.constant 0 : i32
    return %c0_i32, %c0_i32_0 : i32, i32
  }
  func.func @transform_3(%arg0: i32) -> (i32, i32, i32) {
    %c0_i32 = arith.constant 0 : i32
    %c0_i32_0 = arith.constant 0 : i32
    %c0_i32_1 = arith.constant 0 : i32
    return %arg0, %c0_i32, %c0_i32_0 : i32, i32, i32
  }
}

</mosaic_0001>

<bundles_post_ra>
// kernel: tpu_custom_call.1
= control target key start
LH: loop header
LB: loop body
LE: loop exit
PB: predicated region body
PF: predicated region fallthrough
CT: control target
= control target key end

     0   :  { %8 = vsyncpa [#allocation3], 0  ;;  %s824_s0 = inlined_call_operand.hbm [shape: f32[2,32,256], index: 0, kind: input, shape index: {}]   ;;  %s825_s1 = inlined_call_operand.vmem [shape: f32[32,2], index: 1, kind: input, shape index: {}]   ;;  %s826_s2 = inlined_call_operand.vmem [shape: f32[32,2], index: 2, kind: input, shape index: {}]   ;;  %s827_s3 = inlined_call_operand.hbm [shape: f32[2,32,256], index: 3, kind: output, shape index: {}]  }
   0x1   :  { %10 = vsyncpa [#allocation3 + $0x1], 0 }
   0x2   :  { %11 = vsyncpa [#allocation4], 0 }
   0x3   :  { %13 = vsyncpa [#allocation4 + $0x1], 0  ;;  %s594_s12 = smov 0   ;;  %s596_s13 = smov 0  }
   0x4   :  { %s598_s14 = smov 0   ;;  %s600_s15 = smov 0  }
   0x5 LB: > { %s615_s16 = sadd.s32 4294967295, %s566_s15   ;;  %s384_s17 = sadd.s32 4294967294, %s566_s15   ;;  %s566_s15 = sphi %s600_s15, %s840_s15   ;;  %s562_s14 = sphi %s598_s14, %s839_s14   ;;  %s558_s13 = sphi %s596_s13, %s838_s13   ;;  %s554_s12 = sphi %s594_s12, %s837_s12  }
   0x6   : > { %s619_s18 = sadd.s32 1, %s566_s15   ;;  %s26_s19 = sadd.s32 1, %s562_s14 }
   0x7   : > { %s23_s20 = ssub.s32 %s566_s15, %s619_s18  ;;  %p33_p0 = scmp.ne.s32.totalorder %s562_s14, %s558_s13 }
   0x8   : > { %p24_p1 = scmp.eq.s32.totalorder %s23_s20, 0  ;;  %p34_p2 = scmp.eq.s32.totalorder %s566_s15, 0 }
   0x9   : > { %p39_p3 = scmp.ne.s32.totalorder %s558_s13, %s554_s12  ;;  %p40_p4 = scmp.eq.s32.totalorder %s615_s16, 0 }
   0xa   : > { %s631_s21 = scalar_select %p24_p1, %s562_s14, %s26_s19  }
   0xb   : > { %p633_p5 = por %p34_p2, %p33_p0  ;;  %p637_p6 = por %p40_p4, %p39_p3 }
   0xc   : > { %p105_p7 = scmp.eq.s32.totalorder %s615_s16, 1  ;;  %p111_p8 = scmp.eq.s32.totalorder %s384_s17, 1 }
   0xd   : > { %p416_p10 = scmp.lt.s32.totalorder %s566_s15, 2  ;;  %s137_s26 = sand.u32 1, %s562_s14  }
   0xe   : > { %p644_p11 = por %p105_p7, %p33_p0  ;;  %p648_p12 = por %p111_p8, %p39_p3 }
   0xf   : > { %s402_s27 = sshll.u32 %s566_s15, 10  ;;  %s387_s28 = sshll.u32 %s137_s26, 6 }
  0x10   : > { %s831_s24 = scalar_select %p644_p11, 1, 0 }
  0x11   : > { %s832_s25 = scalar_select %p648_p12, 1, 0 }
  0x12   : > { %s657_s4 = scalar_lea.hbm %s824_s0, %s402_s27  ;;  %s141_s5 = scalar_lea.vmem [#allocation2], %s387_s28 }
  0x13   : > { %s148_s6 = sshll.u32 %s141_s5, 4  ;;  %p661_p13 = pnand %p416_p10, %p633_p5  ;;  %s665_s6 = int_to_ptr.vmem [resolvable:$true] %s148_s6 }
  0x14   : > { %s667_s8 = scalar_lea.sflag [#allocation3], %s137_s26  ;;  %s470_s9 = scalar_lea.hbm %s657_s4, 1024 }
  0x15   : > { %p471_p0 = scmp.ne.s32.totalorder %s657_s4, %s470_s9  ;;  %p472_p1 = pneg %p661_p13 }
  0x16   : > { %s475_s17 = scalar_lea.hbm %s824_s0, 2048  ;;  %p476_p4 = scmp.lt.u32.totalorder %s657_s4, %s824_s0 }
  0x17   : > { %p473_p2 = pnand %p472_p1, %p471_p0  ;;  %p477_p5 = scmp.lt.u32.totalorder %s475_s17, %s470_s9 }
  0x18   : > { %p479_p8 = scmp.lt.u32.totalorder %s470_s9, %s657_s4 }
  0x19   : > { %p474_p3 = pneg %p473_p2  ;;  %p478_p7 = por %p477_p5, %p476_p4 }
  0x1b   : > { %p480_p10 = por %p479_p8, %p478_p7 }
  0x1d   : > { %p481_p9 = pnand %p480_p10, %p474_p3 }
  0x1f   : > { %484 = shalt.err (!%p481_p9)
}
  0x20   : > { %s485_s22 = scalar_lea.vmem %s665_s6, 1024  ;;  %s568_s26 = smov [#allocation2]  }
  0x21   : > { %p486_p0 = scmp.ne.s32.totalorder %s665_s6, %s485_s22  ;;  %s490_s27 = sshll.u32 %s568_s26, 4  ;;  %s491_s27 = int_to_ptr.vmem [resolvable:$false] %s490_s27 }
  0x22   : > { %s492_s28 = scalar_lea.vmem %s491_s27, 2048  ;;  %p493_p11 = scmp.lt.s32.totalorder %s665_s6, %s491_s27 }
  0x23   : > { %p488_p2 = pnand %p486_p0, %p472_p1  ;;  %p494_p4 = scmp.lt.s32.totalorder %s492_s28, %s485_s22 }
  0x25   : > { %p489_p12 = pneg %p488_p2  ;;  %p495_p5 = por %p494_p4, %p493_p11 }
  0x27   : > { %p496_p7 = pnand %p495_p5, %p489_p12 }
  0x29   : > { %499 = shalt.err (!%p496_p7)
}
  0x2a   : > { %s569_s29 = smov 256   ;;  %s570_s30 = smov 16  }
  0x2b   : > { %411 = dma.hbm_to_vmem [thread:$0]  (!%p661_p13), %s657_s4, 1024, %s665_s6, %s667_s8, %s569_s29, %s569_s29, %s570_s30  }
  0x2c   : > { %p390_p9 = scmp.ge.s32.totalorder %s566_s15, 1  ;;  %p156_p1 = scmp.lt.s32.totalorder %s566_s15, 3 }
  0x2e   : > { %p157_p3 = pnand %p390_p9, %p156_p1 }
  0x2f   : > { %s698_s5 = sand.u32 (!%p157_p3), 1, %s558_s13  }
  0x30   : > { %160 = sbr.rel (%p157_p3) target bundleno = 423 (0x1a7), region = 32  ;;  %s391_s9 = sshll.u32 (!%p157_p3), %s698_s5, 6 }
  0x31   : > { %s163_s10 = scalar_lea.sflag (!%p157_p3), [#allocation3], %s698_s5  ;;  %s166_s11 = scalar_lea.vmem (!%p157_p3), [#allocation2], %s391_s9 }
  0x37   : > { %545 = dma.done.wait (%p637_p6), %s163_s10, 1024  }
  0x38   : > { %547 = vsyncadd (%p637_p6), %s163_s10, 4294966272  ;;  %v708_v0 = vld [vmem:[%s166_s11] sm:$0xff]  ;;  %v710_v1 = vld [vmem:[%s166_s11 + $0x8] sm:$0xff]  ;;  %vm222_vm0 = vcmask 15360   ;;  %s403_s23 = sshll.u32 %s615_s16, 10  ;;  %s188_s4 = scalar_lea.vmem [#allocation5], %s391_s9 }
  0x39   : > { %v712_v2 = vld [vmem:[%s166_s11 + $0x20] sm:$0xff]  ;;  %v197_v3 = vadd.f32 %v710_v1, %v708_v0  ;;  %v716_v4 = vld [vmem:[%s166_s11 + $0x28] sm:$0xff]  ;;  %v718_v5 = vld [vmem:[%s166_s11 + $0x10] sm:$0xff]  ;;  %s311_s6 = sshll.u32 %s188_s4, 4  ;;  %s776_s17 = scalar_lea.hbm %s827_s3, %s403_s23  ;;  %s778_s6 = int_to_ptr.vmem [resolvable:$true] %s311_s6 }
  0x3a   : > { %v720_v6 = vld [vmem:[%s166_s11 + $0x18] sm:$0xff]  ;;  %v203_v7 = vadd.f32 %v716_v4, %v712_v2  ;;  %v724_v8 = vld [vmem:[%s166_s11 + $0x30] sm:$0xff]  ;;  %v214_v15 = vld [vmem:[%s825_s1] sm:$0xff]  ;;  %s298_s16 = scalar_lea.sflag [#allocation4], %s698_s5  ;;  %s500_s9 = scalar_lea.vmem %s778_s6, 1024 }
  0x3b   : > { %v726_v9 = vld [vmem:[%s166_s11 + $0x38] sm:$0xff]  ;;  %198 = vadd.xlane.f32.xlu0 %v197_v3  ;;  %v200_v10 = vadd.f32 %v720_v6, %v718_v5  ;;  %v216_v17 = vld [vmem:[%s825_s1 + $0x10] sm:$0xff]  ;;  %v215_v18 = vld [vmem:[%s825_s1 + $0x8] sm:$0xff]  ;;  %p501_p6 = scmp.ne.s32.totalorder %s778_s6, %s500_s9  ;;  %p834_p11 = scmp.ne.s32.totalorder %s831_s24, 0 }
  0x3c   : > { %204 = vadd.xlane.f32.xlu1 %v203_v7  ;;  %v206_v11 = vadd.f32 %v726_v9, %v724_v8  ;;  %v217_v22 = vld [vmem:[%s825_s1 + $0x18] sm:$0xff]  ;;  %v238_v41 = vld [vmem:[%s826_s2 + $0x8] sm:$0xff]  ;;  %v237_v42 = vld [vmem:[%s826_s2] sm:$0xff]  ;;  %s571_s19 = smov [#allocation5]  }
  0x3d   : > { %v240_v44 = vld [vmem:[%s826_s2 + $0x18] sm:$0xff]  ;;  %v239_v45 = vld [vmem:[%s826_s2 + $0x10] sm:$0xff]  ;;  %p502_p12 = pnand %p501_p6, %p834_p11  ;;  %s504_s20 = sshll.u32 %s571_s19, 4  ;;  %s505_s20 = int_to_ptr.vmem [resolvable:$false] %s504_s20 }
  0x3e   : > { %s506_s22 = scalar_lea.vmem %s505_s20, 2048  ;;  %p507_p8 = scmp.lt.s32.totalorder %s778_s6, %s505_s20 }
  0x3f   : > { %201 = vadd.xlane.f32.xlu0 %v200_v10  ;;  %p503_p13 = pneg %p502_p12  ;;  %p508_p10 = scmp.lt.s32.totalorder %s506_s22, %s500_s9 }
  0x40   : > { %207 = vadd.xlane.f32.xlu1 %v206_v11 }
  0x41   : > { %p509_p0 = por %p508_p10, %p507_p8 }
  0x43   : > { %p510_p2 = pnand %p509_p0, %p503_p13 }
  0xc8   : > { %v199_v12 = vpop.xlane.xlu0 %198 }
  0xc9   : > { %v210_v13 = vmul.f32 0.00390625, %v199_v12  ;;  %v205_v14 = vpop.xlane.xlu1 %204 }
  0xca   : > { %v212_v16 = vmul.f32 0.00390625, %v205_v14 }
  0xcb   : > { %v218_v20 = vmul.f32 %v214_v15, %v210_v13 }
  0xcc   : > { %v202_v19 = vpop.xlane.xlu0 %201  ;;  %v220_v25 = vmul.f32 %v216_v17, %v212_v16 }
  0xcd   : > { %v211_v21 = vmul.f32 0.00390625, %v202_v19  ;;  %v208_v23 = vpop.xlane.xlu1 %207  ;;  %v223_v28 = vsel %vm222_vm0, %v218_v20, 0.0 }
  0xce   : > { %v213_v24 = vmul.f32 0.00390625, %v208_v23  ;;  %v226_v31 = vsel %vm222_vm0, %v220_v25, 0.0 }
  0xcf   : > { %v219_v26 = vmul.f32 %v215_v18, %v211_v21 }
  0xd0   : > { %v221_v27 = vmul.f32 %v217_v22, %v213_v24 }
  0xd1   : > { %v224_v29 = vsel %vm222_vm0, %v219_v26, 0.0 }
  0xd2   : > { %v225_v30 = vadd.f32 %v224_v29, %v223_v28  ;;  %v228_v32 = vsel %vm222_vm0, %v221_v27, 0.0 }
  0xd4   : > { %v227_v33 = vadd.f32 %v226_v31, %v225_v30 }
  0xd6   : > { %v229_v34 = vadd.f32 %v228_v32, %v227_v33 }
  0xd8   : > { %v230_v35 = vrot.slane %v229_v34, 4 }
  0xda   : > { %v231_v36 = vadd.f32 %v230_v35, %v229_v34 }
  0xdc   : > { %v232_v37 = vrot.slane %v231_v36, 2 }
  0xde   : > { %v233_v38 = vadd.f32 %v232_v37, %v231_v36 }
  0xe0   : > { %v234_v39 = vrot.slane %v233_v38, 1 }
  0xe2   : > { %v235_v40 = vadd.f32 %v234_v39, %v233_v38 }
  0xe4   : > { %v236_v43 = vmax.f32 %v235_v40, 0.0 }
  0xe6   : > { %v242_v46 = vmul.f32 %v238_v41, %v236_v43  ;;  %v241_v47 = vmul.f32 %v237_v42, %v236_v43  ;;  %v244_v50 = vmul.f32 %v240_v44, %v236_v43  ;;  %v243_v51 = vmul.f32 %v239_v45, %v236_v43 }
  0xe8   : > { %v248_v48 = vsel %vm222_vm0, %v242_v46, 0.0  ;;  %v245_v49 = vsel %vm222_vm0, %v241_v47, 0.0  ;;  %v254_v52 = vsel %vm222_vm0, %v244_v50, 0.0  ;;  %v251_v53 = vsel %vm222_vm0, %v243_v51, 0.0 }
  0xe9   : > { %249 = vadd.xlane.f32.xlu1 %v248_v48  ;;  %246 = vadd.xlane.f32.xlu0 %v245_v49 }
  0xed   : > { %255 = vadd.xlane.f32.xlu1 %v254_v52  ;;  %252 = vadd.xlane.f32.xlu0 %v251_v53 }
 0x176   : > { %v250_v54 = vpop.xlane.xlu1 %249  ;;  %v247_v55 = vpop.xlane.xlu0 %246 }
 0x177   : > { %v394_v56 = vmul.f32 -1.442695, %v250_v54  ;;  %v393_v57 = vmul.f32 -1.442695, %v247_v55 }
 0x179   : > { %454 = vpow2.f32 %v394_v56 }
 0x17a   : > { %456 = vpow2.f32 %v393_v57  ;;  %v256_v58 = vpop.xlane.xlu1 %255  ;;  %v253_v59 = vpop.xlane.xlu0 %252 }
 0x17b   : > { %v396_v60 = vmul.f32 -1.442695, %v256_v58  ;;  %v395_v61 = vmul.f32 -1.442695, %v253_v59 }
 0x17d   : > { %458 = vpow2.f32 %v396_v60 }
 0x17e   : > { %460 = vpow2.f32 %v395_v61 }
 0x183   : > { %v455_v62 = vpop.eup %454 }
 0x184   : > { %v457_v63 = vpop.eup %456  ;;  %v270_v3 = vadd.f32 1.0, %v455_v62 }
 0x185   : > { %v269_v7 = vadd.f32 1.0, %v457_v63 }
 0x186   : > { %462 = vrcp.f32 %v270_v3 }
 0x187   : > { %v459_v10 = vpop.eup %458  ;;  %464 = vrcp.f32 %v269_v7 }
 0x188   : > { %v461_v11 = vpop.eup %460  ;;  %v272_v12 = vadd.f32 1.0, %v459_v10 }
 0x189   : > { %v271_v13 = vadd.f32 1.0, %v461_v11 }
 0x18a   : > { %466 = vrcp.f32 %v272_v12 }
 0x18b   : > { %468 = vrcp.f32 %v271_v13 }
 0x190   : > { %v463_v14 = vpop.eup %462 }
 0x191   : > { %v465_v15 = vpop.eup %464  ;;  %v283_v16 = vmul.f32 %v463_v14, %v718_v5  ;;  %v284_v17 = vmul.f32 %v463_v14, %v720_v6 }
 0x192   : > { %v281_v18 = vmul.f32 %v465_v15, %v708_v0  ;;  %v282_v19 = vmul.f32 %v465_v15, %v710_v1 }
 0x193   : > { %291 = vst [vmem:[%s188_s4 + $0x10] sm:$0xff] %v283_v16  ;;  %292 = vst [vmem:[%s188_s4 + $0x18] sm:$0xff] %v284_v17 }
 0x194   : > { %v467_v20 = vpop.eup %466  ;;  %289 = vst [vmem:[%s188_s4] sm:$0xff] %v281_v18  ;;  %290 = vst [vmem:[%s188_s4 + $0x8] sm:$0xff] %v282_v19 }
 0x195   : > { %v469_v21 = vpop.eup %468  ;;  %v287_v5 = vmul.f32 %v467_v20, %v724_v8  ;;  %v288_v6 = vmul.f32 %v467_v20, %v726_v9 }
 0x196   : > { %v285_v0 = vmul.f32 %v469_v21, %v712_v2  ;;  %v286_v1 = vmul.f32 %v469_v21, %v716_v4 }
 0x197   : > { %295 = vst [vmem:[%s188_s4 + $0x30] sm:$0xff] %v287_v5  ;;  %296 = vst [vmem:[%s188_s4 + $0x38] sm:$0xff] %v288_v6 }
 0x198   : > { %293 = vst [vmem:[%s188_s4 + $0x20] sm:$0xff] %v285_v0  ;;  %294 = vst [vmem:[%s188_s4 + $0x28] sm:$0xff] %v286_v1 }
 0x199   : > { %513 = shalt.err (!%p510_p2)
}
 0x19a   : > { %s514_s26 = scalar_lea.hbm %s776_s17, 1024  ;;  %s518_s29 = scalar_lea.hbm %s827_s3, 2048 }
 0x19b   : > { %p515_p4 = scmp.ne.s32.totalorder %s776_s17, %s514_s26  ;;  %p519_p9 = scmp.lt.u32.totalorder %s776_s17, %s827_s3 }
 0x19c   : > { %p520_p1 = scmp.lt.u32.totalorder %s518_s29, %s514_s26  ;;  %p522_p6 = scmp.lt.u32.totalorder %s514_s26, %s776_s17 }
 0x19d   : > { %p516_p5 = pnand %p515_p4, %p834_p11 }
 0x19e   : > { %p521_p3 = por %p520_p1, %p519_p9 }
 0x19f   : > { %p517_p7 = pneg %p516_p5 }
 0x1a0   : > { %p523_p12 = por %p522_p6, %p521_p3 }
 0x1a2   : > { %p524_p13 = pnand %p523_p12, %p517_p7 }
 0x1a4   : > { %527 = shalt.err (!%p524_p13)
}
 0x1a5   : > { %s572_s11 = smov 256   ;;  %s573_s23 = smov 16  }
 0x1a6   : > { %406 = dma.vmem_to_hbm [thread:$0]  (%p834_p11), %s778_s6, 1024, %s776_s17, %s298_s16, %s572_s11, %s572_s11, %s573_s23  }
 0x1a7 PF: > { %s326_s4 = sand.u32 1, %s554_s12   ;;  %p835_p8 = scmp.ne.s32.totalorder %s832_s25, 0 }
 0x1a8   : > { %p836_p10 = scmp.ge.s32.totalorder %s566_s15, 2  ;;  %s327_s7 = scalar_lea.sflag [#allocation4], %s326_s4 }
 0x1aa   : > { %p413_p0 = pnand %p836_p10, %p835_p8 }
 0x1ac   : > { %549 = dma.done.wait (!%p413_p0), %s327_s7, 1024  }
 0x1ad   : > { %551 = vsyncadd (!%p413_p0), %s327_s7, 4294966272  ;;  %p16_p2 = scmp.ge.s32.totalorder %s619_s18, 4   ;;  %s837_s12 = smov %s558_s13 }
 0x1ae   : > { %s838_s13 = smov %s562_s14  ;;  %s839_s14 = smov %s631_s21 }
 0x1af   : > { %s840_s15 = smov %s619_s18  ;;  %18 = sbr.rel (!%p16_p2) target bundleno = 5 (0x5), region = 77 }
 0x1b6   :  { %332 = vsyncpa [#allocation3], 1 }
 0x1b7   :  { %334 = vsyncpa [#allocation3 + $0x1], 1 }
 0x1b8   :  { %335 = vsyncpa [#allocation4], 1 }
 0x1b9   :  { %337 = vsyncpa [#allocation4 + $0x1], 1 }

</bundles_post_ra>
